<compile_context>
chip_gen: v7x
topology: tpu7x:2x2x1
jax: 0.10.0
libtpu: 0.0.40
codegen_flags: <defaults>
</compile_context>

<pallas_src>
import math

import jax
import jax.numpy as jnp
from jax.experimental import pallas as pl
from jax.experimental.pallas import tpu as pltpu

_BN_EPS = 1e-5


def _round_up(x, m):
    return ((x + m - 1) // m) * m


def _pick_tile(n_pad):
    # n_pad is always a multiple of 128, so this always returns.
    for t in (512, 384, 256, 128):
        if n_pad % t == 0:
            return t
    return 128


def _vmem_limit_bytes():
    # Generation-aware scoped-VMEM limit: physical capacity minus ~8 MiB headroom,
    # capped at 100 MiB (v5e/v6e: 128 MiB -> 100 MiB, v7x: 64 MiB -> 56 MiB).
    try:
        cap = pltpu.get_tpu_info().vmem_capacity_bytes
    except Exception:
        cap = 64 << 20
    return int(min(cap - (8 << 20), 100 << 20))


def _gin_layer_kernel(adj_ref, hsrc_ref, hself_ref, w1_ref, t1_ref,
                      w2_ref, t2_ref, s3_ref, t3_ref, eps_ref,
                      out_ref, acc_ref):
    k = pl.program_id(1)

    @pl.when(k == 0)
    def _():
        acc_ref[...] = jnp.zeros_like(acc_ref)

    # Dominant stream: bf16 adjacency tile x bf16 source-feature tile on the
    # native bf16 MXU path, accumulated into an f32 VMEM scratch.
    acc_ref[...] += jnp.dot(adj_ref[...], hsrc_ref[...],
                            preferred_element_type=jnp.float32)

    @pl.when(k == pl.num_programs(1) - 1)
    def _():
        # GINConv update: (1 + eps) * h + sum_neighbors(h).
        rst = (1.0 + eps_ref[0]) * hself_ref[...].astype(jnp.float32) + acc_ref[...]
        # MLP hidden layer; BN1 scale folded into W1, bias + BN shift folded into t1.
        z = jnp.dot(rst, w1_ref[...], preferred_element_type=jnp.float32) + t1_ref[...]
        z = jnp.maximum(z, 0.0)
        # MLP output layer; ApplyNodeFunc BN2 scale folded into W2, then ReLU.
        z = jnp.dot(z, w2_ref[...], preferred_element_type=jnp.float32) + t2_ref[...]
        z = jnp.maximum(z, 0.0)
        # GIN-level BN3 + ReLU (cannot fold through the preceding ReLU).
        z = jnp.maximum(z * s3_ref[...] + t3_ref[...], 0.0)
        out_ref[...] = z.astype(out_ref.dtype)


def _fold_bn(gamma, beta, mean, var, bias=None):
    """Inference-mode BN (optionally absorbing the preceding linear bias)."""
    scale = gamma * jax.lax.rsqrt(var + _BN_EPS)
    shift = beta - mean * scale
    if bias is not None:
        shift = shift + bias * scale
    return scale.reshape(1, -1), shift.reshape(1, -1)


def gin_layer_forward(adj_p, h_p, layer, *, tile_n, tile_k, vmem_limit):
    n_pad, d_in = h_p.shape
    d_hid = layer["w1"].shape[1]

    # Hoisted (wrapper-side) preprocessing: fold BN running stats + linear biases.
    # s1 / s2 are folded straight into the W1 / W2 columns.
    s1, t1 = _fold_bn(*layer["bn1"], bias=layer["b1"])
    s2, t2 = _fold_bn(*layer["bn2"], bias=layer["b2"])
    s3, t3 = _fold_bn(*layer["bn3"])
    w1 = (layer["w1"] * s1).astype(jnp.float32)
    w2 = (layer["w2"] * s2).astype(jnp.float32)
    eps = jnp.asarray(layer["eps"], jnp.float32).reshape(1)

    grid = (n_pad // tile_n, n_pad // tile_k)
    vec = pl.BlockSpec((1, d_hid), lambda i, k: (0, 0))

    flops = (2 * n_pad * n_pad * d_in          # A @ h
             + 2 * n_pad * d_in * d_hid        # rst @ W1
             + 2 * n_pad * d_hid * d_hid       # z @ W2
             + 10 * n_pad * d_hid)             # epilogue vector ops
    bytes_accessed = (2 * n_pad * n_pad                            # adjacency (bf16)
                      + 2 * (n_pad // tile_n) * n_pad * d_in       # re-streamed h_src (bf16)
                      + 2 * n_pad * d_in                           # h_self (bf16)
                      + 4 * (d_in * d_hid + d_hid * d_hid + 4 * d_hid)
                      + 2 * n_pad * d_hid)                         # output h (bf16)

    return pl.pallas_call(
        _gin_layer_kernel,
        out_shape=jax.ShapeDtypeStruct((n_pad, d_hid), jnp.bfloat16),
        grid=grid,
        in_specs=[
            pl.BlockSpec((tile_n, tile_k), lambda i, k: (i, k)),   # adjacency tile (streamed)
            pl.BlockSpec((tile_k, d_in), lambda i, k: (k, 0)),     # source features (streamed)
            pl.BlockSpec((tile_n, d_in), lambda i, k: (i, 0)),     # self features, (1+eps)*h term
            pl.BlockSpec((d_in, d_hid), lambda i, k: (0, 0)),      # W1 (BN1 scale folded)
            vec,                                                   # t1
            pl.BlockSpec((d_hid, d_hid), lambda i, k: (0, 0)),     # W2 (BN2 scale folded)
            vec, vec, vec,                                         # t2, s3, t3
            pl.BlockSpec(memory_space=pltpu.MemorySpace.SMEM),     # eps scalar
        ],
        out_specs=pl.BlockSpec((tile_n, d_hid), lambda i, k: (i, 0)),
        scratch_shapes=[pltpu.VMEM((tile_n, d_in), jnp.float32)],  # f32 agg accumulator
        compiler_params=pltpu.CompilerParams(
            dimension_semantics=("parallel", "arbitrary"),
            vmem_limit_bytes=vmem_limit),
        cost_estimate=pl.CostEstimate(
            flops=int(flops), transcendentals=0, bytes_accessed=int(bytes_accessed)),
    )(adj_p, h_p, h_p, w1, t1, w2, t2, s3, t3, eps)


def gin_forward(adj, h, params, *, tile_n=None, tile_k=None):
    """Pallas equivalent of GIN.forward(h) with a dense adjacency `adj`."""
    n = h.shape[0]
    # Pad N to a fixed 128 multiple (decoupled from the tile size) so padding waste
    # in the quadratic adjacency stream stays below 128 rows/cols. Padded rows/cols
    # of the adjacency are zero, so real-node aggregation is unperturbed.
    n_pad = _round_up(n, 128)
    if tile_n is None:
        tile_n = _pick_tile(n_pad)
    if tile_k is None:
        tile_k = _pick_tile(n_pad)
    assert n_pad % tile_n == 0 and tile_n % 128 == 0, (n_pad, tile_n)
    assert n_pad % tile_k == 0 and tile_k % 128 == 0, (n_pad, tile_k)

    vmem_limit = _vmem_limit_bytes()

    # Binary adjacency is exact in bf16; halving bytes on the dominant n^2 stream.
    adj_p = jnp.zeros((n_pad, n_pad), jnp.bfloat16).at[:n, :n].set(adj.astype(jnp.bfloat16))
    h_p = jnp.zeros((n_pad, h.shape[1]), jnp.bfloat16).at[:n, :].set(h.astype(jnp.bfloat16))
    for layer in params:
        h_p = gin_layer_forward(adj_p, h_p, layer, tile_n=tile_n, tile_k=tile_k,
                                vmem_limit=vmem_limit)
    return h_p[:n].astype(jnp.float32)


# ----------------------------- pure-JAX reference -----------------------------

def _bn_ref(x, bn):
    gamma, beta, mean, var = bn
    return (x - mean) * jax.lax.rsqrt(var + _BN_EPS) * gamma + beta


def gin_reference(adj, h, params, stream_dtype=None):
    """f32 reference. With stream_dtype=bfloat16 it mimics the kernel's bf16
    adjacency / inter-layer activation stream (math still f32)."""
    if stream_dtype is not None:
        adj = adj.astype(stream_dtype).astype(jnp.float32)
    for p in params:
        if stream_dtype is not None:
            h = h.astype(stream_dtype).astype(jnp.float32)
        rst = (1.0 + p["eps"]) * h + adj @ h
        z = jax.nn.relu(_bn_ref(rst @ p["w1"] + p["b1"], p["bn1"]))
        z = jax.nn.relu(_bn_ref(z @ p["w2"] + p["b2"], p["bn2"]))
        h = jax.nn.relu(_bn_ref(z, p["bn3"]))
    return h


# ------------------------------- param init ----------------------------------

def init_gin_params(key, num_layers, input_dim, hidden_dim):
    params = []
    for layer in range(num_layers):
        d_in = input_dim if layer == 0 else hidden_dim
        key, k1, k2, k3, k4, *kb = jax.random.split(key, 17)
        b1_bound = 1.0 / math.sqrt(d_in)
        b2_bound = 1.0 / math.sqrt(hidden_dim)
        w1 = jax.random.uniform(k1, (d_in, hidden_dim), jnp.float32, -b1_bound, b1_bound)
        b1 = jax.random.uniform(k2, (hidden_dim,), jnp.float32, -b1_bound, b1_bound)
        w2 = jax.random.uniform(k3, (hidden_dim, hidden_dim), jnp.float32, -b2_bound, b2_bound)
        b2 = jax.random.uniform(k4, (hidden_dim,), jnp.float32, -b2_bound, b2_bound)

        def bn(ka, kb_, kc, kd):
            gamma = jax.random.uniform(ka, (hidden_dim,), jnp.float32, 0.5, 1.5)
            beta = 0.1 * jax.random.normal(kb_, (hidden_dim,), jnp.float32)
            mean = 0.1 * jax.random.normal(kc, (hidden_dim,), jnp.float32)
            # Running variances > 1 so the synthetic net actually normalizes the
            # sum-pooled activations (keeps magnitudes O(1) like a trained model).
            var = jax.random.uniform(kd, (hidden_dim,), jnp.float32, 2.0, 6.0)
            return (gamma, beta, mean, var)

        params.append(dict(
            w1=w1, b1=b1, w2=w2, b2=b2,
            bn1=bn(*kb[0:4]),   # BN inside the MLP
            bn2=bn(*kb[4:8]),   # ApplyNodeFunc BN
            bn3=bn(*kb[8:12]),  # GIN-level BN
            eps=0.0,            # learn_eps=False -> eps initialised to 0
        ))
    return params


if __name__ == "__main__":
    num_layers = 2      # GIN layers
    input_dim = 64
    hidden_dim = 128    # hidden axis kept lane-dense (full 128-lane vregs)
    n_nodes = 200       # pads to 256; with 128-tiles below the grid is (2, 2)

    key = jax.random.PRNGKey(0)
    k_adj, k_h, k_p = jax.random.split(key, 3)

    # Deterministic random undirected graph, no self loops (self term is (1+eps)*h).
    upper = jax.random.bernoulli(k_adj, 0.05, (n_nodes, n_nodes)).astype(jnp.float32)
    adj = jnp.triu(upper, k=1)
    adj = adj + adj.T

    h = jax.random.normal(k_h, (n_nodes, input_dim), jnp.float32)
    params = init_gin_params(k_p, num_layers, input_dim, hidden_dim)

    # Small tiles chosen deliberately so the demo exercises the K-tiled
    # accumulator (2 k-steps) and multiple parallel node tiles (2 i-steps).
    out = gin_forward(adj, h, params, tile_n=128, tile_k=128)
    out = jax.block_until_ready(out)
    assert out.shape == (n_nodes, hidden_dim)

    # Tight structural check vs. a reference that mimics the kernel's bf16
    # adjacency / activation stream (isolates kernel bugs from quantization).
    ref_bf16 = gin_reference(adj, h, params, stream_dtype=jnp.bfloat16)
    assert jnp.allclose(out, ref_bf16, rtol=1e-2, atol=1e-2), \
        float(jnp.max(jnp.abs(out - ref_bf16)))

    # Loose check vs. the pure-f32 reference (bounds the bf16 streaming noise).
    ref_f32 = gin_reference(adj, h, params)
    assert jnp.allclose(out, ref_f32, rtol=5e-2, atol=5e-2), \
        float(jnp.max(jnp.abs(out - ref_f32)))

    print("KERNEL_OK")
</pallas_src>

<mosaic_0001>
module attributes {stable_mosaic.version = 11 : i64} {
  func.func @_gin_layer_kernel(%arg0: i32, %arg1: i32, %arg2: memref<128x128xbf16, #tpu.memory_space<vmem>>, %arg3: memref<128x64xbf16, #tpu.memory_space<vmem>>, %arg4: memref<128x64xbf16, #tpu.memory_space<vmem>>, %arg5: memref<64x128xf32, #tpu.memory_space<vmem>>, %arg6: memref<1x128xf32, #tpu.memory_space<vmem>>, %arg7: memref<128x128xf32, #tpu.memory_space<vmem>>, %arg8: memref<1x128xf32, #tpu.memory_space<vmem>>, %arg9: memref<1x128xf32, #tpu.memory_space<vmem>>, %arg10: memref<1x128xf32, #tpu.memory_space<vmem>>, %arg11: memref<1xf32, #tpu.memory_space<smem>>, %arg12: memref<128x128xbf16, #tpu.memory_space<vmem>>, %arg13: memref<128x64xf32, #tpu.memory_space<vmem>>) attributes {dimension_semantics = [#tpu.dimension_semantics<parallel>, #tpu.dimension_semantics<arbitrary>], iteration_bounds = array<i64: 2, 2>, scalar_prefetch = 0 : i64, scratch_operands = 1 : i64, tpu.core_type = #tpu.core_type<tc>, window_params = [{transform_indices = @transform_0, window_bounds = array<i64: 128, 128>}, {transform_indices = @transform_1, window_bounds = array<i64: 128, 64>}, {transform_indices = @transform_2, window_bounds = array<i64: 128, 64>}, {pipeline_mode = #tpu.pipeline_mode<synchronous>, transform_indices = @transform_3, window_bounds = array<i64: 64, 128>}, {pipeline_mode = #tpu.pipeline_mode<synchronous>, transform_indices = @transform_4, window_bounds = array<i64: 1, 128>}, {pipeline_mode = #tpu.pipeline_mode<synchronous>, transform_indices = @transform_5, window_bounds = array<i64: 128, 128>}, {pipeline_mode = #tpu.pipeline_mode<synchronous>, transform_indices = @transform_6, window_bounds = array<i64: 1, 128>}, {pipeline_mode = #tpu.pipeline_mode<synchronous>, transform_indices = @transform_7, window_bounds = array<i64: 1, 128>}, {pipeline_mode = #tpu.pipeline_mode<synchronous>, transform_indices = @transform_8, window_bounds = array<i64: 1, 128>}, {transform_indices = @transform_9, window_bounds = array<i64: 1>}, {transform_indices = @transform_10, window_bounds = array<i64: 128, 128>}]} {
    %c0_i32 = arith.constant 0 : i32
    %0 = arith.cmpi eq, %arg1, %c0_i32 : i32
    %1 = arith.extui %0 : i1 to i32
    %c0_i32_0 = arith.constant 0 : i32
    %2 = arith.cmpi ne, %1, %c0_i32_0 : i32
    scf.if %2 {
      %cst_9 = arith.constant 0.000000e+00 : f32
      %12 = vector.broadcast %cst_9 : f32 to vector<128x64xf32>
      %c0_10 = arith.constant 0 : index
      %c0_11 = arith.constant 0 : index
      %13 = vector.load %arg13[%c0_10, %c0_11] : memref<128x64xf32, #tpu.memory_space<vmem>>, vector<128x64xf32>
      tpu.vector_store %arg13[%c0_10, %c0_11], %12 {strides = array<i32>} : memref<128x64xf32, #tpu.memory_space<vmem>>, vector<128x64xf32>,
    } else {
    }
    %c0 = arith.constant 0 : index
    %c0_1 = arith.constant 0 : index
    %3 = vector.load %arg13[%c0, %c0_1] : memref<128x64xf32, #tpu.memory_space<vmem>>, vector<128x64xf32>
    %c0_2 = arith.constant 0 : index
    %c0_3 = arith.constant 0 : index
    %4 = vector.load %arg2[%c0_2, %c0_3] : memref<128x128xbf16, #tpu.memory_space<vmem>>, vector<128x128xbf16>
    %c0_4 = arith.constant 0 : index
    %c0_5 = arith.constant 0 : index
    %5 = vector.load %arg3[%c0_4, %c0_5] : memref<128x64xbf16, #tpu.memory_space<vmem>>, vector<128x64xbf16>
    %cst = arith.constant dense<0.000000e+00> : vector<128x64xf32>
    %6 = tpu.matmul %4, %5, %cst {dimension_numbers = #tpu.dot_dimension_numbers<[1], [0], [0], [1], [0, 0, 1, 1], [], []>} : vector<128x128xbf16>, vector<128x64xbf16>, vector<128x64xf32> -> vector<128x64xf32>
    %7 = arith.addf %3, %6 : vector<128x64xf32>
    %c0_6 = arith.constant 0 : index
    %c0_7 = arith.constant 0 : index
    %8 = vector.load %arg13[%c0_6, %c0_7] : memref<128x64xf32, #tpu.memory_space<vmem>>, vector<128x64xf32>
    tpu.vector_store %arg13[%c0_6, %c0_7], %7 {strides = array<i32>} : memref<128x64xf32, #tpu.memory_space<vmem>>, vector<128x64xf32>,
    %c1_i32 = arith.constant 1 : i32
    %9 = arith.cmpi eq, %arg1, %c1_i32 : i32
    %10 = arith.extui %9 : i1 to i32
    %c0_i32_8 = arith.constant 0 : i32
    %11 = arith.cmpi ne, %10, %c0_i32_8 : i32
    scf.if %11 {
      %c0_9 = arith.constant 0 : index
      %12 = memref.load %arg11[%c0_9] : memref<1xf32, #tpu.memory_space<smem>>
      %cst_10 = arith.constant 1.000000e+00 : f32
      %13 = arith.addf %cst_10, %12 : f32
      %c0_11 = arith.constant 0 : index
      %c0_12 = arith.constant 0 : index
      %14 = vector.load %arg4[%c0_11, %c0_12] : memref<128x64xbf16, #tpu.memory_space<vmem>>, vector<128x64xbf16>
      %15 = arith.extf %14 : vector<128x64xbf16> to vector<128x64xf32>
      %16 = vector.broadcast %13 : f32 to vector<128x64xf32>
      %17 = arith.mulf %16, %15 : vector<128x64xf32>
      %c0_13 = arith.constant 0 : index
      %c0_14 = arith.constant 0 : index
      %18 = vector.load %arg13[%c0_13, %c0_14] : memref<128x64xf32, #tpu.memory_space<vmem>>, vector<128x64xf32>
      %19 = arith.addf %17, %18 : vector<128x64xf32>
      %c0_15 = arith.constant 0 : index
      %c0_16 = arith.constant 0 : index
      %20 = vector.load %arg5[%c0_15, %c0_16] : memref<64x128xf32, #tpu.memory_space<vmem>>, vector<64x128xf32>
      %cst_17 = arith.constant dense<0.000000e+00> : vector<128x128xf32>
      %21 = tpu.matmul %19, %20, %cst_17 {dimension_numbers = #tpu.dot_dimension_numbers<[1], [0], [0], [1], [0, 0, 1, 1], [], []>} : vector<128x64xf32>, vector<64x128xf32>, vector<128x128xf32> -> vector<128x128xf32>
      %c0_18 = arith.constant 0 : index
      %c0_19 = arith.constant 0 : index
      %22 = vector.load %arg6[%c0_18, %c0_19] : memref<1x128xf32, #tpu.memory_space<vmem>>, vector<1x128xf32>
      %23 = vector.broadcast %22 : vector<1x128xf32> to vector<128x128xf32>
      %24 = arith.addf %21, %23 : vector<128x128xf32>
      %cst_20 = arith.constant 0.000000e+00 : f32
      %25 = vector.broadcast %cst_20 : f32 to vector<128x128xf32>
      %26 = arith.maximumf %24, %25 : vector<128x128xf32>
      %c0_21 = arith.constant 0 : index
      %c0_22 = arith.constant 0 : index
      %27 = vector.load %arg7[%c0_21, %c0_22] : memref<128x128xf32, #tpu.memory_space<vmem>>, vector<128x128xf32>
      %cst_23 = arith.constant dense<0.000000e+00> : vector<128x128xf32>
      %28 = tpu.matmul %26, %27, %cst_23 {dimension_numbers = #tpu.dot_dimension_numbers<[1], [0], [0], [1], [0, 0, 1, 1], [], []>} : vector<128x128xf32>, vector<128x128xf32>, vector<128x128xf32> -> vector<128x128xf32>
      %c0_24 = arith.constant 0 : index
      %c0_25 = arith.constant 0 : index
      %29 = vector.load %arg8[%c0_24, %c0_25] : memref<1x128xf32, #tpu.memory_space<vmem>>, vector<1x128xf32>
      %30 = vector.broadcast %29 : vector<1x128xf32> to vector<128x128xf32>
      %31 = arith.addf %28, %30 : vector<128x128xf32>
      %cst_26 = arith.constant 0.000000e+00 : f32
      %32 = vector.broadcast %cst_26 : f32 to vector<128x128xf32>
      %33 = arith.maximumf %31, %32 : vector<128x128xf32>
      %c0_27 = arith.constant 0 : index
      %c0_28 = arith.constant 0 : index
      %34 = vector.load %arg9[%c0_27, %c0_28] : memref<1x128xf32, #tpu.memory_space<vmem>>, vector<1x128xf32>
      %35 = vector.broadcast %34 : vector<1x128xf32> to vector<128x128xf32>
      %36 = arith.mulf %33, %35 : vector<128x128xf32>
      %c0_29 = arith.constant 0 : index
      %c0_30 = arith.constant 0 : index
      %37 = vector.load %arg10[%c0_29, %c0_30] : memref<1x128xf32, #tpu.memory_space<vmem>>, vector<1x128xf32>
      %38 = vector.broadcast %37 : vector<1x128xf32> to vector<128x128xf32>
      %39 = arith.addf %36, %38 : vector<128x128xf32>
      %cst_31 = arith.constant 0.000000e+00 : f32
      %40 = vector.broadcast %cst_31 : f32 to vector<128x128xf32>
      %41 = arith.maximumf %39, %40 : vector<128x128xf32>
      %42 = arith.truncf %41 : vector<128x128xf32> to vector<128x128xbf16>
      %c0_32 = arith.constant 0 : index
      %c0_33 = arith.constant 0 : index
      %43 = vector.load %arg12[%c0_32, %c0_33] : memref<128x128xbf16, #tpu.memory_space<vmem>>, vector<128x128xbf16>
      tpu.vector_store %arg12[%c0_32, %c0_33], %42 {strides = array<i32>} : memref<128x128xbf16, #tpu.memory_space<vmem>>, vector<128x128xbf16>,
    } else {
    }
    return
  }
  func.func @transform_0(%arg0: i32, %arg1: i32) -> (i32, i32) {
    %c0_i32 = arith.constant 0 : i32
    return %arg0, %arg1 : i32, i32
  }
  func.func @transform_1(%arg0: i32, %arg1: i32) -> (i32, i32) {
    %c0_i32 = arith.constant 0 : i32
    %c0_i32_0 = arith.constant 0 : i32
    return %arg1, %c0_i32 : i32, i32
  }
  func.func @transform_2(%arg0: i32, %arg1: i32) -> (i32, i32) {
    %c0_i32 = arith.constant 0 : i32
    %c0_i32_0 = arith.constant 0 : i32
    return %arg0, %c0_i32 : i32, i32
  }
  func.func @transform_3(%arg0: i32, %arg1: i32) -> (i32, i32) {
    %c0_i32 = arith.constant 0 : i32
    %c0_i32_0 = arith.constant 0 : i32
    %c0_i32_1 = arith.constant 0 : i32
    return %c0_i32, %c0_i32_0 : i32, i32
  }
  func.func @transform_4(%arg0: i32, %arg1: i32) -> (i32, i32) {
    %c0_i32 = arith.constant 0 : i32
    %c0_i32_0 = arith.constant 0 : i32
    %c0_i32_1 = arith.constant 0 : i32
    return %c0_i32, %c0_i32_0 : i32, i32
  }
  func.func @transform_5(%arg0: i32, %arg1: i32) -> (i32, i32) {
    %c0_i32 = arith.constant 0 : i32
    %c0_i32_0 = arith.constant 0 : i32
    %c0_i32_1 = arith.constant 0 : i32
    return %c0_i32, %c0_i32_0 : i32, i32
  }
  func.func @transform_6(%arg0: i32, %arg1: i32) -> (i32, i32) {
    %c0_i32 = arith.constant 0 : i32
    %c0_i32_0 = arith.constant 0 : i32
    %c0_i32_1 = arith.constant 0 : i32
    return %c0_i32, %c0_i32_0 : i32, i32
  }
  func.func @transform_7(%arg0: i32, %arg1: i32) -> (i32, i32) {
    %c0_i32 = arith.constant 0 : i32
    %c0_i32_0 = arith.constant 0 : i32
    %c0_i32_1 = arith.constant 0 : i32
    return %c0_i32, %c0_i32_0 : i32, i32
  }
  func.func @transform_8(%arg0: i32, %arg1: i32) -> (i32, i32) {
    %c0_i32 = arith.constant 0 : i32
    %c0_i32_0 = arith.constant 0 : i32
    %c0_i32_1 = arith.constant 0 : i32
    return %c0_i32, %c0_i32_0 : i32, i32
  }
  func.func @transform_9(%arg0: i32, %arg1: i32) -> i32 {
    %c0_i32 = arith.constant 0 : i32
    %c0_i32_0 = arith.constant 0 : i32
    return %c0_i32 : i32
  }
  func.func @transform_10(%arg0: i32, %arg1: i32) -> (i32, i32) {
    %c0_i32 = arith.constant 0 : i32
    %c0_i32_0 = arith.constant 0 : i32
    return %arg0, %c0_i32 : i32, i32
  }
}

</mosaic_0001>

<bundles_post_ra>
// kernel: tpu_custom_call.1
= control target key start
LH: loop header
LB: loop body
LE: loop exit
PB: predicated region body
PF: predicated region fallthrough
CT: control target
= control target key end

     0   :  { %s2850_s0 = inlined_call_operand.vmem [shape: bf16[256,256], index: 0, kind: input, shape index: {}]   ;;  %s2851_s1 = inlined_call_operand.vmem [shape: bf16[256,64], index: 1, kind: input, shape index: {}]   ;;  %s2852_s2 = inlined_call_operand.vmem [shape: bf16[256,64], index: 2, kind: input, shape index: {}]   ;;  %s2853_s3 = inlined_call_operand.hbm [shape: f32[64,128], index: 3, kind: input, shape index: {}]   ;;  %s2854_s4 = inlined_call_operand.vmem [shape: f32[1,128], index: 4, kind: input, shape index: {}]   ;;  %s2855_s5 = inlined_call_operand.vmem [shape: f32[128,128], index: 5, kind: input, shape index: {}]   ;;  %s2856_s6 = inlined_call_operand.vmem [shape: f32[1,128], index: 6, kind: input, shape index: {}]   ;;  %s2857_s7 = inlined_call_operand.vmem [shape: f32[1,128], index: 7, kind: input, shape index: {}]   ;;  %s2858_s8 = inlined_call_operand.vmem [shape: f32[1,128], index: 8, kind: input, shape index: {}]   ;;  %s2859_s9 = inlined_call_operand.<no memory space> [shape: f32[1], index: 9, kind: input, shape index: {}]   ;;  %s2860_s10 = inlined_call_operand.hbm [shape: bf16[256,128], index: 10, kind: output, shape index: {}]  }
   0x1   :  { %2873 = sst [smem:[#allocation19_spill]] %s2857_s7 }
   0x2   :  { %2874 = sst [smem:[#allocation20_spill]] %s2858_s8 }
   0x3   :  { %2875 = sst [smem:[#allocation21_spill]] %s2860_s10 }
   0x4   :  { %15 = sst [smem:[#allocation3]] %s2859_s9 }
   0x5   :  { %16 = vsyncpa [#allocation6], 0 }
   0x6   :  { %17 = vsyncpa [#allocation7], 0 }
   0x7   :  { %19 = vsyncpa [#allocation7 + $0x1], 0  ;;  %s2390_s15 = smov 0   ;;  %s2392_s16 = smov 0  }
   0x8   :  { %s2394_s17 = smov 0   ;;  %s2396_s18 = smov 0  }
   0x9   :  { %s2398_s19 = smov 0   ;;  %s2400_s20 = smov 0  }
   0xa   :  { %s2402_s21 = smov 0   ;;  %s2404_s22 = smov 0  }
   0xb   :  { %s2406_s9 = smov 0   ;;  %s2408_s23 = smov 0  }
   0xc LB: > { %2876 = sst [smem:[#allocation11_spill]] %s2287_s15  ;;  %s1602_s24 = sadd.s32 4294967295, %s2323_s23   ;;  %s2323_s23 = sphi %s2408_s23, %s25_s23   ;;  %s2319_s9 = sphi %s2406_s9, %s2914_s9   ;;  %s2315_s22 = sphi %s2404_s22, %s2913_s22   ;;  %s2311_s21 = sphi %s2402_s21, %s2912_s21   ;;  %s2307_s20 = sphi %s2400_s20, %s2911_s20   ;;  %s2303_s19 = sphi %s2398_s19, %s2910_s19   ;;  %s2299_s18 = sphi %s2396_s18, %s2909_s18   ;;  %s2295_s17 = sphi %s2394_s17, %s2903_s17   ;;  %s2291_s16 = sphi %s2392_s16, %s2908_s16   ;;  %s2287_s15 = sphi %s2390_s15, %s2907_s15  }
   0xd   : > { %2877 = sst [smem:[#allocation12_spill]] %s2295_s17  ;;  %s1603_s25 = sadd.s32 4294967294, %s2323_s23  }
   0xe   : > { %s34_s26 = sadd.s32 1, %s2315_s22  ;;  %s37_s27 = sadd.s32 1, %s2319_s9 }
   0xf   : > { %p35_p0 = scmp.ge.s32.totalorder %s34_s26, 2  ;;  %s46_s28 = sadd.s32 1, %s2303_s19 }
  0x10   : > { %p53_p1 = scmp.ne.s32.totalorder %s2303_s19, %s2299_s18  ;;  %p54_p2 = scmp.eq.s32.totalorder %s2323_s23, 0 }
  0x11   : > { %s2916_s26 = smov (%p35_p0, %s34_s26), 0  ;;  %s2918_s27 = smov (!%p35_p0, %s37_s27), %s2319_s9 }
  0x12   : > { %2878 = sst [smem:[#allocation13_spill]] %s2916_s26  ;;  %s42_s29 = ssub.s32 %s2315_s22, %s2916_s26 }
  0x13   : > { %p2453_p3 = por %p54_p2, %p53_p1  ;;  %p39_p4 = scmp.ge.s32.totalorder %s2918_s27, 2 }
  0x14   : > { %s271_s11 = sadd.s32 1, %s2295_s17  ;;  %p281_p5 = scmp.ne.s32.totalorder %s2295_s17, %s2291_s16 }
  0x15   : > { %s2879_s30 = scalar_select %p2453_p3, 1, 0 }
  0x16   : > { %p282_p6 = scmp.eq.s32.totalorder %s1602_s24, 3  ;;  %s2920_s27 = smov (%p39_p4, %s2918_s27), 0 }
  0x17   : > { %2880 = sst [smem:[#allocation14_spill]] %s2920_s27  ;;  %p287_p8 = scmp.ne.s32.totalorder %s2291_s16, %s2287_s15 }
  0x18   : > { %p2462_p7 = por %p282_p6, %p281_p5  ;;  %s41_s13 = ssub.s32 %s2319_s9, %s2920_s27 }
  0x19   : > { %p288_p9 = scmp.eq.s32.totalorder %s1603_s25, 3  ;;  %s43_s14 = sor.u32 %s42_s29, %s41_s13 }
  0x1a   : > { %s2881_s12 = scalar_select %p2462_p7, 1, 0 }
  0x1b   : > { %p269_p10 = scmp.eq.s32.totalorder %s41_s13, 0  ;;  %p44_p11 = scmp.eq.s32.totalorder %s43_s14, 0 }
  0x1c   : > { %2882 = sst [smem:[#allocation15_spill]] %s2881_s12  ;;  %p2470_p12 = por %p288_p9, %p287_p8 }
  0x1d   : > { %s2475_s10 = scalar_select %p269_p10, %s2295_s17, %s271_s11  }
  0x1e   : > { %s2883_s26 = scalar_select %p2470_p12, 1, 0 }
  0x1f   : > { %2885 = sst [smem:[#allocation17_spill]] %s2475_s10  ;;  %p1604_p13 = scmp.ge.s32.totalorder %s2323_s23, 1 }
  0x20   : > { %2884 = sst [smem:[#allocation16_spill]] %s2883_s26  ;;  %p295_p0 = scmp.lt.s32.totalorder %s2323_s23, 5 }
  0x21   : > { %s2478_s8 = scalar_select %p44_p11, %s2303_s19, %s46_s28  }
  0x22   : > { %p2482_p1 = scmp.eq.s32.totalorder %s1602_s24, 0  ;;  %p2486_p2 = pnand %p1604_p13, %p295_p0 }
  0x23   : > { %2886 = sst [smem:[#allocation18_spill]] %s2478_s8  ;;  %s2325_s29 = smov [#allocation5]  }
  0x24   : > { %s2887_s7 = scalar_select %p2482_p1, 1, 0 }
  0x25   : > { %s2888_s25 = scalar_select %p2486_p2, 1, 0 }
  0x26   : > { %s307_s13 = sshll.u32 %s2325_s29, 4  ;;  %p2068_p4 = pneg %p2486_p2  ;;  %s308_s13 = int_to_ptr.vmem [resolvable:$true] %s307_s13 }
  0x27   : > { %s2181_s14 = scalar_lea.hbm %s2853_s3, 1024 }
  0x28   : > { %p2494_p5 = pnand %p2482_p1, %p2068_p4  ;;  %p2182_p6 = scmp.ne.s32.totalorder %s2853_s3, %s2181_s14 }
  0x29   : > { %p2188_p11 = scmp.lt.u32.totalorder %s2181_s14, %s2853_s3 }
  0x2a   : > { %p2183_p8 = pneg %p2494_p5 }
  0x2c   : > { %p2184_p9 = pnand %p2183_p8, %p2182_p6 }
  0x2e   : > { %p2185_p10 = pneg %p2184_p9 }
  0x30   : > { %p2190_p13 = pnand %p2188_p11, %p2185_p10 }
  0x32   : > { %2193 = shalt.err (!%p2190_p13)
}
  0x33   : > { %s2194_s17 = scalar_lea.vmem %s308_s13, 1024  ;;  %p2202_p7 = scmp.lt.s32.totalorder %s308_s13, %s308_s13 }
  0x34   : > { %p2195_p0 = scmp.ne.s32.totalorder %s308_s13, %s2194_s17  ;;  %p2203_p1 = scmp.lt.s32.totalorder %s2194_s17, %s2194_s17 }
  0x36   : > { %p2197_p4 = pnand %p2195_p0, %p2183_p8  ;;  %p2204_p2 = por %p2203_p1, %p2202_p7 }
  0x38   : > { %p2198_p12 = pneg %p2197_p4 }
  0x3a   : > { %p2205_p3 = pnand %p2204_p2, %p2198_p12 }
  0x3c   : > { %2208 = shalt.err (!%p2205_p3)
}
  0x3d   : > { %s2326_s8 = smov 128   ;;  %s2327_s27 = smov 8  }
  0x3e   : > { %2071 = dma.hbm_to_vmem [thread:$0]  (!%p2494_p5), %s2853_s3, 1024, %s308_s13, [#allocation6], %s2326_s8, %s2326_s8, %s2327_s27  }
  0x3f   : > { %p1606_p6 = scmp.ge.s32.totalorder %s2323_s23, 4 }
  0x40   : > { %p2890_p9 = scmp.ne.s32.totalorder (!%p1606_p6), %s2879_s30, 0 }
  0x41   : > { %335 = sbr.rel (%p1606_p6) target bundleno = 88 (0x58), region = 44 }
  0x48   : > { %338 = sbr.rel (!%p2890_p9) target bundleno = 88 (0x58), region = 48  ;;  %s340_s10 = sand.u32 (%p2890_p9), 1, %s2303_s19  }
  0x49   : > { %s1678_s17 = sshll.u32 (%p2890_p9), %s2319_s9, 5  ;;  %s1607_s14 = sshll.u32 (%p2890_p9), %s340_s10, 6 }
  0x4a   : > { %s345_s29 = sadd.s32 (%p2890_p9), %s2315_s22, %s1678_s17  ;;  %s342_s30 = scalar_lea.vmem (%p2890_p9), [#allocation4], %s1607_s14 }
  0x4b   : > { %s1610_s26 = sshll.u32 (%p2890_p9), %s345_s29, 2 }
  0x4c   : > { %s2523_s12 = scalar_lea.vmem (%p2890_p9), %s2850_s0, %s1610_s26 }
  0x4d   : > { %v363_v0 = vld [vmem:[%s2523_s12] sm:$0xf] (%p2890_p9)  ;;  %v365_v1 = vld [vmem:[%s2523_s12 + $0x8] sm:$0xf] (%p2890_p9)  ;;  %v367_v2 = vld [vmem:[%s2523_s12 + $0x10] sm:$0xf] (%p2890_p9) }
  0x4e   : > { %364 = vst [vmem:[%s342_s30] sm:$0xf] (%p2890_p9), %v363_v0  ;;  %366 = vst [vmem:[%s342_s30 + $0x4] sm:$0xf] (%p2890_p9), %v365_v1  ;;  %v369_v3 = vld [vmem:[%s2523_s12 + $0x18] sm:$0xf] (%p2890_p9) }
  0x4f   : > { %368 = vst [vmem:[%s342_s30 + $0x8] sm:$0xf] %v367_v2  ;;  %v371_v4 = vld [vmem:[%s2523_s12 + $0x20] sm:$0xf]  ;;  %v373_v5 = vld [vmem:[%s2523_s12 + $0x28] sm:$0xf] }
  0x50   : > { %370 = vst [vmem:[%s342_s30 + $0xc] sm:$0xf] %v369_v3  ;;  %372 = vst [vmem:[%s342_s30 + $0x10] sm:$0xf] %v371_v4  ;;  %v375_v6 = vld [vmem:[%s2523_s12 + $0x30] sm:$0xf] }
  0x51   : > { %374 = vst [vmem:[%s342_s30 + $0x14] sm:$0xf] %v373_v5  ;;  %v377_v7 = vld [vmem:[%s2523_s12 + $0x38] sm:$0xf]  ;;  %v379_v8 = vld [vmem:[%s2523_s12 + $0x40] sm:$0xf] }
  0x52   : > { %376 = vst [vmem:[%s342_s30 + $0x18] sm:$0xf] %v375_v6  ;;  %378 = vst [vmem:[%s342_s30 + $0x1c] sm:$0xf] %v377_v7  ;;  %v381_v9 = vld [vmem:[%s2523_s12 + $0x48] sm:$0xf] }
  0x53   : > { %380 = vst [vmem:[%s342_s30 + $0x20] sm:$0xf] %v379_v8  ;;  %v383_v10 = vld [vmem:[%s2523_s12 + $0x50] sm:$0xf]  ;;  %v385_v11 = vld [vmem:[%s2523_s12 + $0x58] sm:$0xf] }
  0x54   : > { %382 = vst [vmem:[%s342_s30 + $0x24] sm:$0xf] %v381_v9  ;;  %384 = vst [vmem:[%s342_s30 + $0x28] sm:$0xf] %v383_v10  ;;  %v387_v12 = vld [vmem:[%s2523_s12 + $0x60] sm:$0xf] }
  0x55   : > { %386 = vst [vmem:[%s342_s30 + $0x2c] sm:$0xf] %v385_v11  ;;  %v389_v13 = vld [vmem:[%s2523_s12 + $0x68] sm:$0xf]  ;;  %v391_v14 = vld [vmem:[%s2523_s12 + $0x70] sm:$0xf] }
  0x56   : > { %388 = vst [vmem:[%s342_s30 + $0x30] sm:$0xf] %v387_v12  ;;  %390 = vst [vmem:[%s342_s30 + $0x34] sm:$0xf] %v389_v13  ;;  %v393_v15 = vld [vmem:[%s2523_s12 + $0x78] sm:$0xf] }
  0x57   : > { %392 = vst [vmem:[%s342_s30 + $0x38] sm:$0xf] %v391_v14  ;;  %394 = vst [vmem:[%s342_s30 + $0x3c] sm:$0xf] %v393_v15 }
  0x58 PF: > { %p2891_p3 = scmp.ne.s32.totalorder %s2888_s25, 0 }
  0x59   : > { %s473_s15 = sand.u32 (!%p2891_p3), 1, %s2299_s18   ;;  %p2892_p7 = scmp.ne.s32.totalorder (!%p2891_p3), %s2887_s7, 0 }
  0x5a   : > { %470 = sbr.rel (%p2891_p3) target bundleno = 872 (0x368), region = 97  ;;  %s1612_s26 = sshll.u32 (!%p2891_p3), %s473_s15, 6 }
  0x5b   : > { %s2544_s13 = scalar_lea.vmem (!%p2891_p3), [#allocation4], %s1612_s26 }
  0x61   : > { %2278 = dma.done.wait (%p2892_p7), [#allocation6], 1024  }
  0x62   : > { %2280 = vsyncadd (%p2892_p7), [#allocation6], 4294966272  ;;  %s521_s12 = sand.u32 1, %s2291_s16   ;;  %s1615_s8 = sshll.u32 %s2307_s20, 4 }
  0x63   : > { %s1614_s25 = sshll.u32 %s521_s12, 6  ;;  %p526_p12 = scmp.lt.s32.totalorder %s1615_s8, 31 }
  0x64   : > { %s1617_s27 = sshll.u32 %s2311_s21, 4  ;;  %s2565_s28 = scalar_lea.vmem [#allocation8], %s1614_s25 }
  0x65   : > { %s2922_s8 = smov (!%p526_p12, %s1615_s8), 31  ;;  %p532_p1 = scmp.lt.s32.totalorder %s1617_s27, 31 }
  0x66   : > { %s1616_s18 = sshll.u32 %s2922_s8, 2  ;;  %p1619_p2 = scmp.ne.s32.totalorder %s2307_s20, 0 }
  0x67   : > { %s2558_s10 = scalar_lea.vmem %s2851_s1, %s1616_s18  ;;  %s2924_s27 = smov (!%p532_p1, %s1617_s27), 31  ;;  %vm543_vm0 = vcmask (!%p1619_p2), 523264   ;;  %v2328_v16 = vmov (!%p1619_p2), 0.0  }
  0x68   : > { %s1618_s7 = sshll.u32 %s2924_s27, 2  ;;  %542 = sbr.rel (%p1619_p2) target bundleno = 112 (0x70), region = 109  ;;  %544 = vst.msk [vmem:[#allocation2] sm:$0xff] (!%p1619_p2), %vm543_vm0, %v2328_v16  ;;  %545 = vst.msk [vmem:[#allocation2 + $0x8] sm:$0xff] (!%p1619_p2), %vm543_vm0, %v2328_v16 }
  0x69   : > { %s2563_s29 = scalar_lea.vmem %s2852_s2, %s1618_s7  ;;  %546 = vst.msk [vmem:[#allocation2 + $0x10] sm:$0xff] (!%p1619_p2), %vm543_vm0, %v2328_v16  ;;  %547 = vst.msk [vmem:[#allocation2 + $0x18] sm:$0xff] (!%p1619_p2), %vm543_vm0, %v2328_v16 }
  0x6a   : > { %548 = vst.msk [vmem:[#allocation2 + $0x20] sm:$0xff] (!%p1619_p2), %vm543_vm0, %v2328_v16  ;;  %549 = vst.msk [vmem:[#allocation2 + $0x28] sm:$0xff] (!%p1619_p2), %vm543_vm0, %v2328_v16 }
  0x6b   : > { %550 = vst.msk [vmem:[#allocation2 + $0x30] sm:$0xff] (!%p1619_p2), %vm543_vm0, %v2328_v16  ;;  %551 = vst.msk [vmem:[#allocation2 + $0x38] sm:$0xff] (!%p1619_p2), %vm543_vm0, %v2328_v16 }
  0x6c   : > { %552 = vst.msk [vmem:[#allocation2 + $0x40] sm:$0xff] (!%p1619_p2), %vm543_vm0, %v2328_v16  ;;  %553 = vst.msk [vmem:[#allocation2 + $0x48] sm:$0xff] (!%p1619_p2), %vm543_vm0, %v2328_v16 }
  0x6d   : > { %554 = vst.msk [vmem:[#allocation2 + $0x50] sm:$0xff] (!%p1619_p2), %vm543_vm0, %v2328_v16  ;;  %555 = vst.msk [vmem:[#allocation2 + $0x58] sm:$0xff] (!%p1619_p2), %vm543_vm0, %v2328_v16 }
  0x6e   : > { %556 = vst.msk [vmem:[#allocation2 + $0x60] sm:$0xff] (!%p1619_p2), %vm543_vm0, %v2328_v16  ;;  %557 = vst.msk [vmem:[#allocation2 + $0x68] sm:$0xff] (!%p1619_p2), %vm543_vm0, %v2328_v16 }
  0x6f   : > { %558 = vst.msk [vmem:[#allocation2 + $0x70] sm:$0xff] %vm543_vm0, %v2328_v16  ;;  %559 = vst.msk [vmem:[#allocation2 + $0x78] sm:$0xff] %vm543_vm0, %v2328_v16 }
  0x70 PF: > { %v2165_v17 = vld [vmem:[%s2558_s10] sm:$0xff]   ;;  %v2166_v18 = vld [vmem:[%s2558_s10 + $0x8] sm:$0xff]   ;;  %v2167_v19 = vld [vmem:[%s2558_s10 + $0x10] sm:$0xff]   ;;  %vm817_vm1 = vcmask 523264   ;;  %p1636_p5 = scmp.ne.s32.totalorder %s2307_s20, 1 }
  0x71   : > { %1854 = vmatprep.subr.bf16.mxu0 %v2165_v17  ;;  %2030 = vmatprep.subr.bf16.mxu1 %v2165_v17  ;;  %v2168_v20 = vld [vmem:[%s2558_s10 + $0x18] sm:$0xff]   ;;  %v2173_v21 = vld [vmem:[%s2544_s13] sm:$0xff]   ;;  %v2170_v24 = vld [vmem:[%s2558_s10 + $0x28] sm:$0xff]   ;;  %s838_s30 = sld [smem:[#allocation3]] (!%p1636_p5) }
  0x72   : > { %1855 = vmatpush3.bf16.msra.mxu0 %v2165_v17  ;;  %2038 = vmatpush3.bf16.msra.mxu1 %v2165_v17  ;;  %v2174_v22 = vld [vmem:[%s2544_s13 + $0x20] sm:$0xff]   ;;  %v2171_v25 = vld [vmem:[%s2558_s10 + $0x30] sm:$0xff]   ;;  %v2172_v26 = vld [vmem:[%s2558_s10 + $0x38] sm:$0xff]   ;;  %s2893_s24 = sld [smem:[#allocation19_spill]] (!%p1636_p5) }
  0x73   : > { %1856 = vmatprep.subr.bf16.mxu0 %v2166_v18  ;;  %2031 = vmatprep.subr.bf16.mxu1 %v2166_v18  ;;  %v2169_v23 = vld [vmem:[%s2558_s10 + $0x20] sm:$0xff]   ;;  %v2175_v27 = vld [vmem:[%s2544_s13 + $0x8] sm:$0xff]   ;;  %v2177_v29 = vld [vmem:[%s2544_s13 + $0x10] sm:$0xff]   ;;  %s2894_s10 = sld [smem:[#allocation20_spill]] (!%p1636_p5) }
  0x74   : > { %1870 = vmatprep.mubr.bf16.mxu0 %v2173_v21  ;;  %1878 = vmatprep.mubr.bf16.mxu1 %v2174_v22  ;;  %v2176_v28 = vld [vmem:[%s2544_s13 + $0x28] sm:$0xff]   ;;  %v2178_v30 = vld [vmem:[%s2544_s13 + $0x30] sm:$0xff]   ;;  %v2179_v31 = vld [vmem:[%s2544_s13 + $0x18] sm:$0xff]  }
  0x75   : > { %v2180_v32 = vld [vmem:[%s2544_s13 + $0x38] sm:$0xff]   ;;  %v562_v33 = vld [vmem:[#allocation2 + $0x10] sm:$0xff]  ;;  %v560_v35 = vld [vmem:[#allocation2] sm:$0xff] }
  0x76   : > { %1857 = vmatpush3.bf16.msra.mxu0 %v2166_v18  ;;  %2039 = vmatpush3.bf16.msra.mxu1 %v2166_v18  ;;  %v570_v34 = vld [vmem:[#allocation2 + $0x50] sm:$0xff]  ;;  %v568_v36 = vld [vmem:[#allocation2 + $0x40] sm:$0xff]  ;;  %v563_v39 = vld [vmem:[#allocation2 + $0x18] sm:$0xff] }
  0x77   : > { %1858 = vmatprep.subr.bf16.mxu0 %v2167_v19  ;;  %2032 = vmatprep.subr.bf16.mxu1 %v2167_v19  ;;  %v571_v40 = vld [vmem:[#allocation2 + $0x58] sm:$0xff]  ;;  %v561_v45 = vld [vmem:[#allocation2 + $0x8] sm:$0xff]  ;;  %v566_v57 = vld [vmem:[#allocation2 + $0x30] sm:$0xff]  ;;  %s839_s20 = sadd.f32 (!%p1636_p5), 1.0, %s838_s30 }
  0x78   : > { %v569_v46 = vld [vmem:[#allocation2 + $0x48] sm:$0xff]  ;;  %v574_v58 = vld [vmem:[#allocation2 + $0x70] sm:$0xff]  ;;  %v564_v59 = vld [vmem:[#allocation2 + $0x20] sm:$0xff] }
  0x79   : > { %v572_v60 = vld [vmem:[#allocation2 + $0x60] sm:$0xff]  ;;  %v567_v63 = vld [vmem:[#allocation2 + $0x38] sm:$0xff]  ;;  %v565_v5 = vld [vmem:[#allocation2 + $0x28] sm:$0xff] }
  0x7a   : > { %1859 = vmatpush3.bf16.msra.mxu0 %v2167_v19  ;;  %2040 = vmatpush3.bf16.msra.mxu1 %v2167_v19  ;;  %v575_v0 = vld [vmem:[#allocation2 + $0x78] sm:$0xff]  ;;  %v573_v6 = vld [vmem:[#allocation2 + $0x68] sm:$0xff]  ;;  %v921_v17 = vld [vmem:[#allocation5] sm:$0xff] (!%p1636_p5) }
  0x7b   : > { %1860 = vmatprep.subr.bf16.mxu0 %v2168_v20  ;;  %2033 = vmatprep.subr.bf16.mxu1 %v2168_v20  ;;  %v922_v18 = vld [vmem:[#allocation5 + $0x8] sm:$0xff] (!%p1636_p5)  ;;  %v923_v19 = vld [vmem:[#allocation5 + $0x10] sm:$0xff] (!%p1636_p5)  ;;  %v924_v21 = vld [vmem:[#allocation5 + $0x18] sm:$0xff] (!%p1636_p5) }
  0x7c   : > { %v1986_v22 = vpack.c.bf16 (!%p1636_p5), %v924_v21, %v923_v19  ;;  %v1773_v19 = vld [vmem:[%s2563_s29 + $0x30] sm:$0xff] (!%p1636_p5)   ;;  %v1153_v21 = vld [vmem:[%s2855_s5 + $0x40] sm:$0xff] (!%p1636_p5) }
  0x7e   : > { %1861 = vmatpush3.bf16.msra.mxu0 %v2168_v20  ;;  %2041 = vmatpush3.bf16.msra.mxu1 %v2168_v20  ;;  %v1982_v20 = vpack.c.bf16 (!%p1636_p5), %v922_v18, %v921_v17 }
  0x7f   : > { %1862 = vmatprep.subr.bf16.mxu0 %v2169_v23  ;;  %2034 = vmatprep.subr.bf16.mxu1 %v2169_v23 }
  0x82   : > { %1863 = vmatpush3.bf16.msra.mxu0 %v2169_v23  ;;  %2042 = vmatpush3.bf16.msra.mxu1 %v2169_v23  ;;  %v925_v23 = vld [vmem:[#allocation5 + $0x20] sm:$0xff] (!%p1636_p5) }
  0x83   : > { %1864 = vmatprep.subr.bf16.mxu0 %v2170_v24  ;;  %2035 = vmatprep.subr.bf16.mxu1 %v2170_v24 }
  0x86   : > { %1865 = vmatpush3.bf16.msra.mxu0 %v2170_v24  ;;  %2043 = vmatpush3.bf16.msra.mxu1 %v2170_v24  ;;  %v926_v24 = vld [vmem:[#allocation5 + $0x28] sm:$0xff] (!%p1636_p5) }
  0x87   : > { %1866 = vmatprep.subr.bf16.mxu0 %v2171_v25  ;;  %2036 = vmatprep.subr.bf16.mxu1 %v2171_v25 }
  0x8a   : > { %1867 = vmatpush3.bf16.msra.mxu0 %v2171_v25  ;;  %2044 = vmatpush3.bf16.msra.mxu1 %v2171_v25  ;;  %v1697_v25 = vld [vmem:[%s2563_s29] sm:$0xff] (!%p1636_p5)  }
  0x8b   : > { %1868 = vmatprep.subr.bf16.mxu0 %v2172_v26  ;;  %2037 = vmatprep.subr.bf16.mxu1 %v2172_v26 }
  0x8e   : > { %1869 = vmatpush3.bf16.msra.mxu0 %v2172_v26  ;;  %2045 = vmatpush3.bf16.msra.mxu1 %v2172_v26  ;;  %v1990_v26 = vpack.c.bf16 (!%p1636_p5), %v926_v24, %v925_v23 }
  0x8f   : > { %1983 = vmatprep.subr.bf16.mxu0 (!%p1636_p5), %v1982_v20 }
  0x91   : > { %1871 = vmatmul.mubr.bf16.vlgmr.msra.gmra.mrb[0].mxu0 %v2175_v27  ;;  %1879 = vmatmul.mubr.bf16.vlgmr.msra.gmra.mrb[0].mxu1 %v2176_v28  ;;  %v1698_v27 = vunpack.c.l.bf16 (!%p1636_p5), %v1697_v25  ;;  %v1768_v28 = vld [vmem:[%s2563_s29 + $0x8] sm:$0xff] (!%p1636_p5)  }
  0x92   : > { %1874 = vmatprep.mubr.bf16.mxu0 %v2177_v29  ;;  %1882 = vmatprep.mubr.bf16.mxu1 %v2178_v30  ;;  %v927_v29 = vld [vmem:[#allocation5 + $0x30] sm:$0xff] (!%p1636_p5)  ;;  %v928_v30 = vld [vmem:[#allocation5 + $0x38] sm:$0xff] (!%p1636_p5) }
  0x93   : > { %1985 = vmatpush3.bf16.msra.mxu0 (!%p1636_p5), %v1982_v20 }
  0x94   : > { %1987 = vmatprep.subr.bf16.mxu0 (!%p1636_p5), %v1986_v22 }
  0x97   : > { %1989 = vmatpush3.bf16.msra.mxu0 (!%p1636_p5), %v1986_v22  ;;  %v1154_v22 = vld [vmem:[%s2855_s5 + $0x48] sm:$0xff] (!%p1636_p5) }
  0x98   : > { %1991 = vmatprep.subr.bf16.mxu0 (!%p1636_p5), %v1990_v26 }
  0x99   : > { %1875 = vmatmul.mubr.bf16.gmra.mrb[4].mxu0 %v2179_v31  ;;  %1883 = vmatmul.mubr.bf16.gmra.mrb[4].mxu1 %v2180_v32  ;;  %v1699_v31 = vunpack.c.h.bf16 (!%p1636_p5), %v1697_v25  ;;  %v2619_v32 = vstv (!%p1636_p5), %s839_s20 }
  0x9b   : > { %1993 = vmatpush3.bf16.msra.mxu0 (!%p1636_p5), %v1990_v26 }
 0x164   : > { %v1872_v37 = vpop.f32.mrb[0].mxu0  ;;  %v1880_v38 = vpop.f32.mrb[0].mxu1 }
 0x165   : > { %v803_v41 = vadd.f32 %v1872_v37, %v562_v33  ;;  %v811_v42 = vadd.f32 %v1880_v38, %v570_v34  ;;  %v738_v43 = vpop.f32.mrb[1].mxu0  ;;  %v770_v44 = vpop.f32.mrb[1].mxu1  ;;  %v1702_v34 = vunpack.c.l.bf16 (!%p1636_p5), %v1768_v28  ;;  %v1769_v37 = vld [vmem:[%s2563_s29 + $0x10] sm:$0xff] (!%p1636_p5)  }
 0x166   : > { %v801_v47 = vadd.f32 %v738_v43, %v560_v35  ;;  %v809_v48 = vadd.f32 %v770_v44, %v568_v36  ;;  %v1873_v49 = vpop.f32.mrb[2].mxu0  ;;  %v1881_v50 = vpop.f32.mrb[2].mxu1  ;;  %v1994_v35 = vpack.c.bf16 (!%p1636_p5), %v928_v30, %v927_v29  ;;  %v873_v36 = vmul.f32 (!%p1636_p5), %v1698_v27, %v2619_v32 }
 0x167   : > { %820 = vst.msk [vmem:[#allocation2 + $0x10] sm:$0xff] %vm817_vm1, %v803_v41  ;;  %828 = vst.msk [vmem:[#allocation2 + $0x50] sm:$0xff] %vm817_vm1, %v811_v42  ;;  %v804_v51 = vadd.f32 %v1873_v49, %v563_v39  ;;  %v812_v52 = vadd.f32 %v1881_v50, %v571_v40  ;;  %v741_v53 = vpop.f32.mrb[3].mxu0  ;;  %v773_v54 = vpop.f32.mrb[3].mxu1  ;;  %v874_v39 = vmul.f32 (!%p1636_p5), %v1699_v31, %v2619_v32  ;;  %v1703_v40 = vunpack.c.h.bf16 (!%p1636_p5), %v1768_v28  ;;  %v1148_v49 = vld [vmem:[%s2855_s5 + $0x18] sm:$0xff] (!%p1636_p5) }
 0x168   : > { %818 = vst.msk [vmem:[#allocation2] sm:$0xff] %vm817_vm1, %v801_v47  ;;  %826 = vst.msk [vmem:[#allocation2 + $0x40] sm:$0xff] %vm817_vm1, %v809_v48  ;;  %v802_v55 = vadd.f32 %v741_v53, %v561_v45  ;;  %v810_v56 = vadd.f32 %v773_v54, %v569_v46  ;;  %v875_v42 = vmul.f32 (!%p1636_p5), %v1702_v34, %v2619_v32  ;;  %v1706_v43 = vunpack.c.l.bf16 (!%p1636_p5), %v1769_v37  ;;  %v1770_v45 = vld [vmem:[%s2563_s29 + $0x18] sm:$0xff] (!%p1636_p5)   ;;  %v1145_v46 = vld [vmem:[%s2855_s5] sm:$0xff] (!%p1636_p5) }
 0x169   : > { %821 = vst.msk [vmem:[#allocation2 + $0x18] sm:$0xff] %vm817_vm1, %v804_v51  ;;  %829 = vst.msk [vmem:[#allocation2 + $0x58] sm:$0xff] %vm817_vm1, %v812_v52  ;;  %1995 = vmatprep.subr.bf16.mxu0 (!%p1636_p5), %v1994_v35  ;;  %v1146_v47 = vld [vmem:[%s2855_s5 + $0x8] sm:$0xff] (!%p1636_p5)  ;;  %v1147_v48 = vld [vmem:[%s2855_s5 + $0x10] sm:$0xff] (!%p1636_p5)  ;;  %v876_v51 = vmul.f32 (!%p1636_p5), %v1703_v40, %v2619_v32  ;;  %v1707_v52 = vunpack.c.h.bf16 (!%p1636_p5), %v1769_v37  ;;  %v1722_v29 = vunpack.c.l.bf16 (!%p1636_p5), %v1773_v19 }
 0x16a   : > { %819 = vst.msk [vmem:[#allocation2 + $0x8] sm:$0xff] %vm817_vm1, %v802_v55  ;;  %827 = vst.msk [vmem:[#allocation2 + $0x48] sm:$0xff] %vm817_vm1, %v810_v56  ;;  %1997 = vmatpush3.bf16.msra.mxu0 (!%p1636_p5), %v1994_v35  ;;  %v877_v55 = vmul.f32 (!%p1636_p5), %v1706_v43, %v2619_v32  ;;  %v1710_v56 = vunpack.c.l.bf16 (!%p1636_p5), %v1770_v45  ;;  %v1774_v31 = vld [vmem:[%s2563_s29 + $0x38] sm:$0xff] (!%p1636_p5)   ;;  %v1155_v34 = vld [vmem:[%s2855_s5 + $0x50] sm:$0xff] (!%p1636_p5) }
 0x16b   : > { %v1156_v35 = vld [vmem:[%s2855_s5 + $0x58] sm:$0xff] (!%p1636_p5) }
 0x16c   : > { %v1876_v61 = vpop.f32.mrb[4].mxu0  ;;  %v1884_v62 = vpop.f32.mrb[4].mxu1  ;;  %837 = sbr.rel (%p1636_p5) target bundleno = 844 (0x34c), region = 113 }
 0x16d   : > { %v807_v1 = vadd.f32 %v1876_v61, %v566_v57  ;;  %v815_v2 = vadd.f32 %v1884_v62, %v574_v58  ;;  %v754_v3 = vpop.f32.mrb[5].mxu0  ;;  %v786_v4 = vpop.f32.mrb[5].mxu1  ;;  %v1771_v58 = vld [vmem:[%s2563_s29 + $0x20] sm:$0xff] (!%p1636_p5)   ;;  %v1150_v62 = vld [vmem:[%s2855_s5 + $0x28] sm:$0xff] (!%p1636_p5) }
 0x16e   : > { %v805_v7 = vadd.f32 %v754_v3, %v564_v59  ;;  %v813_v8 = vadd.f32 %v786_v4, %v572_v60  ;;  %v1877_v9 = vpop.f32.mrb[6].mxu0  ;;  %v1885_v10 = vpop.f32.mrb[6].mxu1  ;;  %v891_v44 = vld [vmem:[#allocation2 + $0x10] sm:$0xff] (!%p1636_p5)  ;;  %v1998_v59 = vpack.c.bf16 (!%p1636_p5), %v1146_v47, %v1145_v46  ;;  %v2002_v60 = vpack.c.bf16 (!%p1636_p5), %v1148_v49, %v1147_v48  ;;  %v1149_v61 = vld [vmem:[%s2855_s5 + $0x20] sm:$0xff] (!%p1636_p5)  ;;  %v1158_v46 = vld [vmem:[%s2855_s5 + $0x68] sm:$0xff] (!%p1636_p5) }
 0x16f   : > { %824 = vst.msk [vmem:[#allocation2 + $0x30] sm:$0xff] %vm817_vm1, %v807_v1  ;;  %832 = vst.msk [vmem:[#allocation2 + $0x70] sm:$0xff] %vm817_vm1, %v815_v2  ;;  %v808_v11 = vadd.f32 %v1877_v9, %v567_v63  ;;  %v816_v12 = vadd.f32 %v1885_v10, %v575_v0  ;;  %v757_v13 = vpop.f32.mrb[7].mxu0  ;;  %v789_v14 = vpop.f32.mrb[7].mxu1  ;;  %v889_v33 = vld [vmem:[#allocation2] sm:$0xff] (!%p1636_p5)  ;;  %v907_v53 = vadd.f32 (!%p1636_p5), %v891_v44, %v875_v42  ;;  %v1711_v1 = vunpack.c.h.bf16 (!%p1636_p5), %v1770_v45  ;;  %v1151_v9 = vld [vmem:[%s2855_s5 + $0x30] sm:$0xff] (!%p1636_p5) }
 0x170   : > { %822 = vst.msk [vmem:[#allocation2 + $0x20] sm:$0xff] %vm817_vm1, %v805_v7  ;;  %830 = vst.msk [vmem:[#allocation2 + $0x60] sm:$0xff] %vm817_vm1, %v813_v8  ;;  %v806_v15 = vadd.f32 %v757_v13, %v565_v5  ;;  %v814_v16 = vadd.f32 %v789_v14, %v573_v6  ;;  %v905_v38 = vadd.f32 (!%p1636_p5), %v889_v33, %v873_v36  ;;  %v892_v54 = vld [vmem:[#allocation2 + $0x18] sm:$0xff] (!%p1636_p5)  ;;  %1999 = vmatprep.subr.bf16.mxu0 (!%p1636_p5), %v1998_v59  ;;  %v1772_v7 = vld [vmem:[%s2563_s29 + $0x28] sm:$0xff] (!%p1636_p5)  }
 0x171   : > { %825 = vst.msk [vmem:[#allocation2 + $0x38] sm:$0xff] %vm817_vm1, %v808_v11  ;;  %833 = vst.msk [vmem:[#allocation2 + $0x78] sm:$0xff] %vm817_vm1, %v816_v12  ;;  %v890_v41 = vld [vmem:[#allocation2 + $0x8] sm:$0xff] (!%p1636_p5)  ;;  %v908_v63 = vadd.f32 (!%p1636_p5), %v892_v54, %v876_v51  ;;  %v878_v0 = vmul.f32 (!%p1636_p5), %v1707_v52, %v2619_v32  ;;  %v879_v4 = vmul.f32 (!%p1636_p5), %v1710_v56, %v2619_v32  ;;  %v1714_v5 = vunpack.c.l.bf16 (!%p1636_p5), %v1771_v58  ;;  %v1152_v10 = vld [vmem:[%s2855_s5 + $0x38] sm:$0xff] (!%p1636_p5) }
 0x172   : > { %823 = vst.msk [vmem:[#allocation2 + $0x28] sm:$0xff] %vm817_vm1, %v806_v15  ;;  %831 = vst.msk [vmem:[#allocation2 + $0x68] sm:$0xff] %vm817_vm1, %v814_v16  ;;  %1902 = vmatprep.mubr.msk.f32.mxu0 (!%p1636_p5), %vm817_vm1, %v905_v38  ;;  %v906_v50 = vadd.f32 (!%p1636_p5), %v890_v41, %v874_v39  ;;  %2046 = vmatprep.subr.bf16.mxu1 (!%p1636_p5), %v1998_v59  ;;  %v2006_v8 = vpack.c.bf16 (!%p1636_p5), %v1150_v62, %v1149_v61  ;;  %v1715_v13 = vunpack.c.h.bf16 (!%p1636_p5), %v1771_v58  ;;  %v897_v18 = vld [vmem:[#allocation2 + $0x40] sm:$0xff] (!%p1636_p5)  ;;  %v898_v27 = vld [vmem:[#allocation2 + $0x48] sm:$0xff] (!%p1636_p5) }
 0x173   : > { %2054 = vmatpush3.bf16.msra.mxu1 %v1998_v59  ;;  %v880_v12 = vmul.f32 %v1711_v1, %v2619_v32  ;;  %v881_v16 = vmul.f32 %v1714_v5, %v2619_v32  ;;  %v1718_v17 = vunpack.c.l.bf16 %v1772_v7  ;;  %v2010_v20 = vpack.c.bf16 %v1152_v10, %v1151_v9  ;;  %v899_v30 = vld [vmem:[#allocation2 + $0x50] sm:$0xff]  ;;  %v900_v40 = vld [vmem:[#allocation2 + $0x58] sm:$0xff]  ;;  %v1157_v45 = vld [vmem:[%s2855_s5 + $0x60] sm:$0xff] }
 0x174   : > { %1903 = vmatmul.mubr.msk.f32.vlgmr.msra.gmra.mrb[0].mxu0 %vm817_vm1, %v906_v50  ;;  %2047 = vmatprep.subr.bf16.mxu1 %v2002_v60  ;;  %v882_v24 = vmul.f32 %v1715_v13, %v2619_v32  ;;  %v1719_v25 = vunpack.c.h.bf16 %v1772_v7  ;;  %v2014_v33 = vpack.c.bf16 %v1154_v22, %v1153_v21  ;;  %v1723_v38 = vunpack.c.h.bf16 %v1773_v19  ;;  %v1637_v62 = vld [vmem:[%s2854_s4] ss:$0 sm:$0xff] }
 0x175   : > { %1905 = vmatprep.mubr.msk.f32.mxu0 %vm817_vm1, %v907_v53  ;;  %2001 = vmatpush3.bf16.msra.mxu0 %v1998_v59  ;;  %v913_v26 = vadd.f32 %v897_v18, %v881_v16  ;;  %v883_v28 = vmul.f32 %v1718_v17, %v2619_v32  ;;  %v885_v41 = vmul.f32 %v1722_v29, %v2619_v32  ;;  %v1726_v42 = vunpack.c.l.bf16 %v1774_v31 }
 0x176   : > { %v895_v6 = vld [vmem:[#allocation2 + $0x30] sm:$0xff]  ;;  %2003 = vmatprep.subr.bf16.mxu0 %v2002_v60  ;;  %v914_v36 = vadd.f32 %v898_v27, %v882_v24  ;;  %v884_v37 = vmul.f32 %v1719_v25, %v2619_v32  ;;  %v2018_v44 = vpack.c.bf16 %v1156_v35, %v1155_v34  ;;  %v886_v48 = vmul.f32 %v1723_v38, %v2619_v32 }
 0x177   : > { %v893_v57 = vld [vmem:[#allocation2 + $0x20] sm:$0xff]  ;;  %v911_v14 = vadd.f32 %v895_v6, %v879_v4  ;;  %2055 = vmatpush3.bf16.msra.mxu1 %v2002_v60  ;;  %v915_v39 = vadd.f32 %v899_v30, %v883_v28  ;;  %v1727_v49 = vunpack.c.h.bf16 %v1774_v31  ;;  %v887_v52 = vmul.f32 %v1726_v42, %v2619_v32  ;;  %v903_v53 = vld [vmem:[#allocation2 + $0x70] sm:$0xff] }
 0x178   : > { %v909_v2 = vadd.f32 %v893_v57, %v877_v55  ;;  %1906 = vmatmul.mubr.msk.f32.gmra.mrb[2].mxu0 %vm817_vm1, %v908_v63  ;;  %v896_v15 = vld [vmem:[#allocation2 + $0x38] sm:$0xff]  ;;  %2048 = vmatprep.subr.bf16.mxu1 %v2006_v8  ;;  %v901_v43 = vld [vmem:[#allocation2 + $0x60] sm:$0xff]  ;;  %v916_v47 = vadd.f32 %v900_v40, %v884_v37  ;;  %v2022_v54 = vpack.c.bf16 %v1158_v46, %v1157_v45 }
 0x179   : > { %v894_v3 = vld [vmem:[#allocation2 + $0x28] sm:$0xff]  ;;  %2005 = vmatpush3.bf16.msra.mxu0 %v2002_v60  ;;  %v912_v23 = vadd.f32 %v896_v15, %v880_v12  ;;  %v917_v50 = vadd.f32 %v901_v43, %v885_v41  ;;  %v888_v56 = vmul.f32 %v1727_v49, %v2619_v32  ;;  %v919_v57 = vadd.f32 %v903_v53, %v887_v52  ;;  %v904_v58 = vld [vmem:[#allocation2 + $0x78] sm:$0xff]  ;;  %v1159_v32 = vld [vmem:[%s2855_s5 + $0x70] sm:$0xff] }
 0x17a   : > { %v910_v11 = vadd.f32 %v894_v3, %v878_v0  ;;  %1908 = vmatprep.mubr.msk.f32.mxu0 %vm817_vm1, %v909_v2  ;;  %2007 = vmatprep.subr.bf16.mxu0 %v2006_v8  ;;  %v902_v51 = vld [vmem:[#allocation2 + $0x68] sm:$0xff]  ;;  %v1160_v60 = vld [vmem:[%s2855_s5 + $0x78] sm:$0xff]  ;;  %v2719_v52 = vld [vmem:[%s2893_s24] ss:$0 sm:$0xff] }
 0x17b   : > { %2056 = vmatpush3.bf16.msra.mxu1 %v2006_v8  ;;  %v918_v55 = vadd.f32 %v902_v51, %v886_v48  ;;  %v920_v59 = vadd.f32 %v904_v58, %v888_v56  ;;  %v2026_v61 = vpack.c.bf16 %v1160_v60, %v1159_v32  ;;  %v2713_v48 = vld [vmem:[%s2856_s6] ss:$0 sm:$0xff] }
 0x17c   : > { %1909 = vmatmul.mubr.msk.f32.gmra.mrb[4].mxu0 %vm817_vm1, %v910_v11  ;;  %2049 = vmatprep.subr.bf16.mxu1 %v2010_v20 }
 0x17d   : > { %1911 = vmatprep.mubr.msk.f32.mxu0 %vm817_vm1, %v911_v14  ;;  %2009 = vmatpush3.bf16.msra.mxu0 %v2006_v8 }
 0x17e   : > { %2011 = vmatprep.subr.bf16.mxu0 %v2010_v20 }
 0x17f   : > { %2057 = vmatpush3.bf16.msra.mxu1 %v2010_v20 }
 0x180   : > { %1912 = vmatmul.mubr.msk.f32.gmra.mrb[6].mxu0 %vm817_vm1, %v912_v23  ;;  %2050 = vmatprep.subr.bf16.mxu1 %v2014_v33 }
 0x181   : > { %1914 = vmatprep.mubr.msk.f32.mxu0 %vm817_vm1, %v913_v26  ;;  %2013 = vmatpush3.bf16.msra.mxu0 %v2010_v20 }
 0x182   : > { %2015 = vmatprep.subr.bf16.mxu0 %v2014_v33 }
 0x183   : > { %2058 = vmatpush3.bf16.msra.mxu1 %v2014_v33 }
 0x184   : > { %1915 = vmatmul.mubr.msk.f32.gmra.mrb[8].mxu0 %vm817_vm1, %v914_v36  ;;  %2051 = vmatprep.subr.bf16.mxu1 %v2018_v44 }
 0x185   : > { %1917 = vmatprep.mubr.msk.f32.mxu0 %vm817_vm1, %v915_v39  ;;  %2017 = vmatpush3.bf16.msra.mxu0 %v2014_v33 }
 0x186   : > { %2019 = vmatprep.subr.bf16.mxu0 %v2018_v44 }
 0x187   : > { %2059 = vmatpush3.bf16.msra.mxu1 %v2018_v44 }
 0x188   : > { %1918 = vmatmul.mubr.msk.f32.gmra.mrb[10].mxu0 %vm817_vm1, %v916_v47  ;;  %2052 = vmatprep.subr.bf16.mxu1 %v2022_v54 }
 0x189   : > { %1920 = vmatprep.mubr.msk.f32.mxu0 %vm817_vm1, %v917_v50  ;;  %2021 = vmatpush3.bf16.msra.mxu0 %v2018_v44 }
 0x18a   : > { %2023 = vmatprep.subr.bf16.mxu0 %v2022_v54 }
 0x18b   : > { %2060 = vmatpush3.bf16.msra.mxu1 %v2022_v54 }
 0x18c   : > { %1921 = vmatmul.mubr.msk.f32.gmra.mrb[12].mxu0 %vm817_vm1, %v918_v55  ;;  %2053 = vmatprep.subr.bf16.mxu1 %v2026_v61  ;;  %v2725_v55 = vld [vmem:[%s2894_s10] ss:$0 sm:$0xff] }
 0x18d   : > { %1923 = vmatprep.mubr.msk.f32.mxu0 %vm817_vm1, %v919_v57  ;;  %2025 = vmatpush3.bf16.msra.mxu0 %v2022_v54 }
 0x18e   : > { %2027 = vmatprep.subr.bf16.mxu0 %v2026_v61 }
 0x18f   : > { %2061 = vmatpush3.bf16.msra.mxu1 %v2026_v61 }
 0x190   : > { %1924 = vmatmul.mubr.msk.f32.gmra.mrb[14].mxu0 %vm817_vm1, %v920_v59 }
 0x191   : > { %2029 = vmatpush3.bf16.msra.mxu0 %v2026_v61 }
 0x247   : > { %v1904_v63 = vpop.f32.mrb[0].mxu0 }
 0x248   : > { %v1056_v0 = vadd.f32 %v1904_v63, %v1637_v62  ;;  %v1050_v1 = vpop.f32.mrb[1].mxu0 }
 0x249   : > { %v1051_v2 = vadd.f32 %v1637_v62, %v1050_v1 }
 0x24a   : > { %v1130_v5 = vmax.f32 %v1056_v0, 0.0 }
 0x24b   : > { %v1129_v3 = vmax.f32 %v1051_v2, 0.0  ;;  %v1907_v4 = vpop.f32.mrb[2].mxu0 }
 0x24c   : > { %v1066_v6 = vadd.f32 %v1907_v4, %v1637_v62  ;;  %v1060_v7 = vpop.f32.mrb[3].mxu0 }
 0x24d   : > { %v1061_v8 = vadd.f32 %v1637_v62, %v1060_v7  ;;  %1958 = vmatprep.mubr.f32.mxu0 %v1129_v3 }
 0x24e   : > { %1959 = vmatmul.mubr.f32.vlgmr.msra.gmra.mrb[16].mxu0 %v1130_v5  ;;  %v1132_v11 = vmax.f32 %v1066_v6, 0.0 }
 0x24f   : > { %v1131_v9 = vmax.f32 %v1061_v8, 0.0  ;;  %v1910_v10 = vpop.f32.mrb[4].mxu0 }
 0x250   : > { %v1076_v12 = vadd.f32 %v1910_v10, %v1637_v62  ;;  %v1070_v13 = vpop.f32.mrb[5].mxu0 }
 0x251   : > { %1961 = vmatprep.mubr.f32.mxu0 %v1131_v9  ;;  %v1071_v14 = vadd.f32 %v1637_v62, %v1070_v13 }
 0x252   : > { %1962 = vmatmul.mubr.f32.gmra.mrb[18].mxu0 %v1132_v11  ;;  %v1134_v17 = vmax.f32 %v1076_v12, 0.0 }
 0x253   : > { %v1913_v15 = vpop.f32.mrb[6].mxu0  ;;  %v1133_v16 = vmax.f32 %v1071_v14, 0.0 }
 0x254   : > { %v1086_v18 = vadd.f32 %v1913_v15, %v1637_v62  ;;  %v1080_v19 = vpop.f32.mrb[7].mxu0 }
 0x255   : > { %v1081_v20 = vadd.f32 %v1637_v62, %v1080_v19  ;;  %1964 = vmatprep.mubr.f32.mxu1 %v1133_v16 }
 0x256   : > { %1965 = vmatmul.mubr.f32.vlgmr.msra.gmra.mrb[0].mxu1 %v1134_v17  ;;  %v1136_v23 = vmax.f32 %v1086_v18, 0.0 }
 0x257   : > { %v1135_v21 = vmax.f32 %v1081_v20, 0.0  ;;  %v1916_v22 = vpop.f32.mrb[8].mxu0 }
 0x258   : > { %v1096_v24 = vadd.f32 %v1916_v22, %v1637_v62  ;;  %v1090_v25 = vpop.f32.mrb[9].mxu0 }
 0x259   : > { %v1091_v26 = vadd.f32 %v1637_v62, %v1090_v25  ;;  %1967 = vmatprep.mubr.f32.mxu1 %v1135_v21 }
 0x25a   : > { %1968 = vmatmul.mubr.f32.gmra.mrb[2].mxu1 %v1136_v23  ;;  %v1138_v29 = vmax.f32 %v1096_v24, 0.0 }
 0x25b   : > { %v1137_v27 = vmax.f32 %v1091_v26, 0.0  ;;  %v1919_v28 = vpop.f32.mrb[10].mxu0 }
 0x25c   : > { %v1106_v30 = vadd.f32 %v1919_v28, %v1637_v62  ;;  %v1100_v31 = vpop.f32.mrb[11].mxu0 }
 0x25d   : > { %v1101_v33 = vadd.f32 %v1637_v62, %v1100_v31  ;;  %1970 = vmatprep.mubr.f32.mxu1 %v1137_v27 }
 0x25e   : > { %1971 = vmatmul.mubr.f32.gmra.mrb[4].mxu1 %v1138_v29  ;;  %v1140_v36 = vmax.f32 %v1106_v30, 0.0 }
 0x25f   : > { %v1139_v34 = vmax.f32 %v1101_v33, 0.0  ;;  %v1922_v35 = vpop.f32.mrb[12].mxu0 }
 0x260   : > { %v1116_v37 = vadd.f32 %v1922_v35, %v1637_v62  ;;  %v1110_v38 = vpop.f32.mrb[13].mxu0 }
 0x261   : > { %v1111_v39 = vadd.f32 %v1637_v62, %v1110_v38  ;;  %1973 = vmatprep.mubr.f32.mxu1 %v1139_v34 }
 0x262   : > { %1974 = vmatmul.mubr.f32.gmra.mrb[6].mxu1 %v1140_v36  ;;  %v1142_v42 = vmax.f32 %v1116_v37, 0.0 }
 0x263   : > { %v1141_v40 = vmax.f32 %v1111_v39, 0.0  ;;  %v1925_v41 = vpop.f32.mrb[14].mxu0 }
 0x264   : > { %v1126_v43 = vadd.f32 %v1925_v41, %v1637_v62  ;;  %v1120_v44 = vpop.f32.mrb[15].mxu0 }
 0x265   : > { %v1121_v45 = vadd.f32 %v1637_v62, %v1120_v44  ;;  %1976 = vmatprep.mubr.f32.mxu1 %v1141_v40 }
 0x266   : > { %1977 = vmatmul.mubr.f32.gmra.mrb[8].mxu1 %v1142_v42  ;;  %v1144_v47 = vmax.f32 %v1126_v43, 0.0 }
 0x267   : > { %v1143_v46 = vmax.f32 %v1121_v45, 0.0 }
 0x269   : > { %1979 = vmatprep.mubr.f32.mxu1 %v1143_v46 }
 0x26a   : > { %1980 = vmatmul.mubr.f32.gmra.mrb[10].mxu1 %v1144_v47 }
 0x321   : > { %v1960_v49 = vpop.f32.mrb[16].mxu0 }
 0x322   : > { %v1240_v50 = vadd.f32 %v1960_v49, %v2713_v48  ;;  %v1234_v51 = vpop.f32.mrb[17].mxu0 }
 0x323   : > { %v1235_v53 = vadd.f32 %v2713_v48, %v1234_v51 }
 0x324   : > { %v1314_v54 = vmax.f32 %v1240_v50, 0.0 }
 0x325   : > { %v1313_v56 = vmax.f32 %v1235_v53, 0.0  ;;  %v1963_v57 = vpop.f32.mrb[18].mxu0 }
 0x326   : > { %v1337_v58 = vmul.f32 %v2719_v52, %v1314_v54  ;;  %v1250_v59 = vadd.f32 %v1963_v57, %v2713_v48  ;;  %v1244_v32 = vpop.f32.mrb[19].mxu0 }
 0x327   : > { %v1336_v60 = vmul.f32 %v2719_v52, %v1313_v56  ;;  %v1245_v61 = vadd.f32 %v2713_v48, %v1244_v32 }
 0x328   : > { %v1360_v62 = vadd.f32 %v2725_v55, %v1337_v58  ;;  %v1316_v63 = vmax.f32 %v1250_v59, 0.0 }
 0x329   : > { %v1359_v0 = vadd.f32 %v2725_v55, %v1336_v60  ;;  %v1315_v1 = vmax.f32 %v1245_v61, 0.0  ;;  %v1966_v2 = vpop.f32.mrb[0].mxu1 }
 0x32a   : > { %v1376_v3 = vmax.f32 %v1360_v62, 0.0  ;;  %v1339_v4 = vmul.f32 %v2719_v52, %v1316_v63  ;;  %v1260_v5 = vadd.f32 %v1966_v2, %v2713_v48  ;;  %v1254_v6 = vpop.f32.mrb[1].mxu1 }
 0x32b   : > { %v1375_v7 = vmax.f32 %v1359_v0, 0.0  ;;  %v1338_v8 = vmul.f32 %v2719_v52, %v1315_v1  ;;  %v1255_v9 = vadd.f32 %v2713_v48, %v1254_v6 }
 0x32c   : > { %v1362_v10 = vadd.f32 %v2725_v55, %v1339_v4  ;;  %v1318_v11 = vmax.f32 %v1260_v5, 0.0 }
 0x32d   : > { %v1731_v12 = vpack.c.bf16 %v1376_v3, %v1375_v7  ;;  %v1361_v13 = vadd.f32 %v2725_v55, %v1338_v8  ;;  %v1317_v14 = vmax.f32 %v1255_v9, 0.0  ;;  %v1969_v15 = vpop.f32.mrb[2].mxu1 }
 0x32e   : > { %v1378_v16 = vmax.f32 %v1362_v10, 0.0  ;;  %v1341_v17 = vmul.f32 %v2719_v52, %v1318_v11  ;;  %v1270_v18 = vadd.f32 %v1969_v15, %v2713_v48  ;;  %v1264_v19 = vpop.f32.mrb[3].mxu1 }
 0x32f   : > { %1732 = vst [vmem:[%s2565_s28] sm:$0xff] %v1731_v12   ;;  %v1377_v20 = vmax.f32 %v1361_v13, 0.0  ;;  %v1340_v21 = vmul.f32 %v2719_v52, %v1317_v14  ;;  %v1265_v22 = vadd.f32 %v2713_v48, %v1264_v19 }
 0x330   : > { %v1364_v23 = vadd.f32 %v2725_v55, %v1341_v17  ;;  %v1320_v24 = vmax.f32 %v1270_v18, 0.0 }
 0x331   : > { %v1736_v25 = vpack.c.bf16 %v1378_v16, %v1377_v20  ;;  %v1363_v26 = vadd.f32 %v2725_v55, %v1340_v21  ;;  %v1319_v27 = vmax.f32 %v1265_v22, 0.0  ;;  %v1972_v28 = vpop.f32.mrb[4].mxu1 }
 0x332   : > { %v1380_v29 = vmax.f32 %v1364_v23, 0.0  ;;  %v1343_v30 = vmul.f32 %v2719_v52, %v1320_v24  ;;  %v1280_v31 = vadd.f32 %v1972_v28, %v2713_v48  ;;  %v1274_v33 = vpop.f32.mrb[5].mxu1 }
 0x333   : > { %1775 = vst [vmem:[%s2565_s28 + $0x8] sm:$0xff] %v1736_v25   ;;  %v1379_v34 = vmax.f32 %v1363_v26, 0.0  ;;  %v1342_v35 = vmul.f32 %v2719_v52, %v1319_v27  ;;  %v1275_v36 = vadd.f32 %v2713_v48, %v1274_v33 }
 0x334   : > { %v1366_v37 = vadd.f32 %v2725_v55, %v1343_v30  ;;  %v1322_v38 = vmax.f32 %v1280_v31, 0.0 }
 0x335   : > { %v1741_v39 = vpack.c.bf16 %v1380_v29, %v1379_v34  ;;  %v1365_v40 = vadd.f32 %v2725_v55, %v1342_v35  ;;  %v1321_v41 = vmax.f32 %v1275_v36, 0.0  ;;  %v1975_v42 = vpop.f32.mrb[6].mxu1 }
 0x336   : > { %v1382_v43 = vmax.f32 %v1366_v37, 0.0  ;;  %v1345_v44 = vmul.f32 %v2719_v52, %v1322_v38  ;;  %v1290_v45 = vadd.f32 %v1975_v42, %v2713_v48  ;;  %v1284_v46 = vpop.f32.mrb[7].mxu1 }
 0x337   : > { %1776 = vst [vmem:[%s2565_s28 + $0x10] sm:$0xff] %v1741_v39   ;;  %v1381_v47 = vmax.f32 %v1365_v40, 0.0  ;;  %v1344_v49 = vmul.f32 %v2719_v52, %v1321_v41  ;;  %v1285_v50 = vadd.f32 %v2713_v48, %v1284_v46 }
 0x338   : > { %v1368_v51 = vadd.f32 %v2725_v55, %v1345_v44  ;;  %v1324_v53 = vmax.f32 %v1290_v45, 0.0 }
 0x339   : > { %v1746_v54 = vpack.c.bf16 %v1382_v43, %v1381_v47  ;;  %v1367_v56 = vadd.f32 %v2725_v55, %v1344_v49  ;;  %v1323_v57 = vmax.f32 %v1285_v50, 0.0  ;;  %v1978_v58 = vpop.f32.mrb[8].mxu1 }
 0x33a   : > { %v1384_v59 = vmax.f32 %v1368_v51, 0.0  ;;  %v1347_v32 = vmul.f32 %v2719_v52, %v1324_v53  ;;  %v1300_v60 = vadd.f32 %v1978_v58, %v2713_v48  ;;  %v1294_v61 = vpop.f32.mrb[9].mxu1 }
 0x33b   : > { %1777 = vst [vmem:[%s2565_s28 + $0x18] sm:$0xff] %v1746_v54   ;;  %v1383_v62 = vmax.f32 %v1367_v56, 0.0  ;;  %v1346_v63 = vmul.f32 %v2719_v52, %v1323_v57  ;;  %v1295_v0 = vadd.f32 %v2713_v48, %v1294_v61 }
 0x33c   : > { %v1370_v1 = vadd.f32 %v2725_v55, %v1347_v32  ;;  %v1326_v2 = vmax.f32 %v1300_v60, 0.0 }
 0x33d   : > { %v1751_v3 = vpack.c.bf16 %v1384_v59, %v1383_v62  ;;  %v1369_v4 = vadd.f32 %v2725_v55, %v1346_v63  ;;  %v1325_v5 = vmax.f32 %v1295_v0, 0.0  ;;  %v1981_v6 = vpop.f32.mrb[10].mxu1 }
 0x33e   : > { %v1386_v7 = vmax.f32 %v1370_v1, 0.0  ;;  %v1349_v8 = vmul.f32 %v2719_v52, %v1326_v2  ;;  %v1310_v9 = vadd.f32 %v1981_v6, %v2713_v48  ;;  %v1304_v10 = vpop.f32.mrb[11].mxu1 }
 0x33f   : > { %1778 = vst [vmem:[%s2565_s28 + $0x20] sm:$0xff] %v1751_v3   ;;  %v1385_v11 = vmax.f32 %v1369_v4, 0.0  ;;  %v1348_v12 = vmul.f32 %v2719_v52, %v1325_v5  ;;  %v1305_v13 = vadd.f32 %v2713_v48, %v1304_v10 }
 0x340   : > { %v1372_v14 = vadd.f32 %v2725_v55, %v1349_v8  ;;  %v1328_v15 = vmax.f32 %v1310_v9, 0.0 }
 0x341   : > { %v1756_v16 = vpack.c.bf16 %v1386_v7, %v1385_v11  ;;  %v1371_v17 = vadd.f32 %v2725_v55, %v1348_v12  ;;  %v1327_v18 = vmax.f32 %v1305_v13, 0.0 }
 0x342   : > { %v1388_v19 = vmax.f32 %v1372_v14, 0.0  ;;  %v1351_v20 = vmul.f32 %v2719_v52, %v1328_v15 }
 0x343   : > { %1779 = vst [vmem:[%s2565_s28 + $0x28] sm:$0xff] %v1756_v16   ;;  %v1387_v21 = vmax.f32 %v1371_v17, 0.0  ;;  %v1350_v22 = vmul.f32 %v2719_v52, %v1327_v18 }
 0x344   : > { %v1374_v23 = vadd.f32 %v2725_v55, %v1351_v20 }
 0x345   : > { %v1761_v24 = vpack.c.bf16 %v1388_v19, %v1387_v21  ;;  %v1373_v48 = vadd.f32 %v2725_v55, %v1350_v22 }
 0x346   : > { %v1390_v25 = vmax.f32 %v1374_v23, 0.0 }
 0x347   : > { %1780 = vst [vmem:[%s2565_s28 + $0x30] sm:$0xff] %v1761_v24   ;;  %v1389_v26 = vmax.f32 %v1373_v48, 0.0 }
 0x349   : > { %v1766_v27 = vpack.c.bf16 %v1390_v25, %v1389_v26 }
 0x34b   : > { %1781 = vst [vmem:[%s2565_s28 + $0x38] sm:$0xff] %v1766_v27  }
 0x34c PF: > { %s2895_s7 = sld [smem:[#allocation15_spill]]  ;;  %s1695_s17 = sshll.u32 %s2311_s21, 10 }
 0x34d   : > { %s2896_s20 = sld [smem:[#allocation21_spill]]  ;;  %s1485_s13 = sshll.u32 %s2565_s28, 4  ;;  %s2788_s13 = int_to_ptr.vmem [resolvable:$true] %s1485_s13 }
 0x34e   : > { %s2792_s8 = scalar_lea.sflag [#allocation7], %s521_s12  ;;  %s2209_s25 = scalar_lea.vmem %s2788_s13, 1024 }
 0x34f   : > { %p2210_p8 = scmp.ne.s32.totalorder %s2788_s13, %s2209_s25  ;;  %s2329_s21 = smov [#allocation8]  }
 0x350   : > { %s2213_s27 = sshll.u32 %s2329_s21, 4  ;;  %s2214_s27 = int_to_ptr.vmem [resolvable:$false] %s2213_s27 }
 0x351   : > { %s2215_s18 = scalar_lea.vmem %s2214_s27, 2048  ;;  %p2216_p0 = scmp.lt.s32.totalorder %s2788_s13, %s2214_s27 }
 0x352   : > { %p2898_p10 = scmp.ne.s32.totalorder %s2895_s7, 0  ;;  %p2217_p4 = scmp.lt.s32.totalorder %s2215_s18, %s2209_s25 }
 0x353   : > { %s2897_s26 = smov %s2896_s20  ;;  %s2785_s15 = scalar_lea.hbm %s2896_s20, %s1695_s17 }
 0x354   : > { %p2211_p11 = pnand %p2210_p8, %p2898_p10  ;;  %p2218_p6 = por %p2217_p4, %p2216_p0 }
 0x356   : > { %p2212_p13 = pneg %p2211_p11 }
 0x358   : > { %p2219_p9 = pnand %p2218_p6, %p2212_p13 }
 0x35a   : > { %2222 = shalt.err (!%p2219_p9)
}
 0x35b   : > { %s2223_s12 = scalar_lea.hbm %s2785_s15, 1024  ;;  %s2227_s11 = scalar_lea.hbm %s2897_s26, 2048 }
 0x35c   : > { %p2224_p3 = scmp.ne.s32.totalorder %s2785_s15, %s2223_s12  ;;  %p2228_p1 = scmp.lt.u32.totalorder %s2785_s15, %s2897_s26 }
 0x35d   : > { %p2229_p2 = scmp.lt.u32.totalorder %s2227_s11, %s2223_s12  ;;  %p2231_p8 = scmp.lt.u32.totalorder %s2223_s12, %s2785_s15 }
 0x35e   : > { %p2225_p7 = pnand %p2224_p3, %p2898_p10 }
 0x35f   : > { %p2230_p5 = por %p2229_p2, %p2228_p1 }
 0x360   : > { %p2226_p12 = pneg %p2225_p7 }
 0x361   : > { %p2232_p11 = por %p2231_p8, %p2230_p5 }
 0x363   : > { %p2233_p13 = pnand %p2232_p11, %p2226_p12 }
 0x365   : > { %2236 = shalt.err (!%p2233_p13)
}
 0x366   : > { %s2330_s17 = smov 64   ;;  %s2331_s14 = smov 4  }
 0x367   : > { %2066 = dma.vmem_to_hbm [thread:$0]  (%p2898_p10), %s2788_s13, 1024, %s2785_s15, %s2792_s8, %s2330_s17, %s2330_s17, %s2331_s14  }
 0x368 PF: > { %s2899_s30 = sld [smem:[#allocation11_spill]]  ;;  %s2900_s20 = sld [smem:[#allocation16_spill]] }
 0x369   : > { %p2078_p0 = scmp.ge.s32.totalorder %s2323_s23, 2 }
 0x36e   : > { %s1500_s25 = sand.u32 1, %s2899_s30   ;;  %p2901_p4 = scmp.ne.s32.totalorder %s2900_s20, 0 }
 0x36f   : > { %s1501_s21 = scalar_lea.sflag [#allocation7], %s1500_s25 }
 0x370   : > { %p2073_p6 = pnand %p2078_p0, %p2901_p4 }
 0x372   : > { %2282 = dma.done.wait (!%p2073_p6), %s1501_s21, 1024  }
 0x373   : > { %2284 = vsyncadd (!%p2073_p6), %s1501_s21, 4294966272  ;;  %s25_s23 = sadd.s32 1, %s2323_s23   ;;  %s2902_s27 = sld [smem:[#allocation12_spill]] }
 0x374   : > { %p22_p9 = scmp.ge.s32.totalorder %s25_s23, 6   ;;  %s2903_s17 = sld [smem:[#allocation17_spill]] }
 0x375   : > { %s2904_s7 = sld [smem:[#allocation18_spill]]  ;;  %s2905_s13 = sld [smem:[#allocation13_spill]] }
 0x376   : > { %s2906_s8 = sld [smem:[#allocation14_spill]]  ;;  %s2907_s15 = smov %s2291_s16 }
 0x377   : > { %s2909_s18 = smov %s2303_s19  ;;  %s2911_s20 = smov %s2315_s22 }
 0x378   : > { %s2912_s21 = smov %s2319_s9  ;;  %24 = sbr.rel (!%p22_p9) target bundleno = 12 (0xc), region = 160 }
 0x379   : > { %s2908_s16 = smov %s2902_s27 }
 0x37b   : > { %s2910_s19 = smov %s2904_s7  ;;  %s2913_s22 = smov %s2905_s13 }
 0x37c   : > { %s2914_s9 = smov %s2906_s8 }
 0x37f   :  { %1506 = vsyncpa [#allocation6], 1 }
 0x380   :  { %1508 = vsyncpa [#allocation6 + $0x1], 1 }
 0x381   :  { %1509 = vsyncpa [#allocation7], 1 }
 0x382   :  { %1511 = vsyncpa [#allocation7 + $0x1], 1 }

</bundles_post_ra>
